<compile_context>
chip_gen: v7x
topology: tpu7x:2x2x1
jax: 0.10.0
libtpu: 0.0.40
codegen_flags: <defaults>
</compile_context>

<pallas_src>
import math

import jax
import jax.numpy as jnp
import numpy as np
from jax.experimental import pallas as pl
from jax.experimental.pallas import tpu as pltpu  # noqa: F401  (TPU-specific tuning hooks)

# ---- model dimensions (small, consistent with the module's forward) ----
B, S, D = 2, 8, 32            # batch, seq_length, input_dim
NUM_HEADS = 4
HEAD_DIM = D // NUM_HEADS     # 8
HIDDEN = 64                   # hidden_dim of the feed-forward
OUT_DIM = 16                  # output_dim
EPS = 1e-5                    # nn.LayerNorm default eps
SCALE = HEAD_DIM ** (-0.5)
INV_SQRT2 = 1.0 / math.sqrt(2.0)

BS = B * S                    # 16 flattened activation rows
SC = NUM_HEADS * BS           # 64 packed score columns: col = h*BS + b*S + j
LB = 128                      # lane block: every packed segment starts at k*128 lanes

# ---- packed weight/constant array layout: (WP_ROWS, WP_COLS) f32 ----
# rows 0:32   lanes   0:384 : Wq | Wk | Wv  (one 128-lane block each; Wq pre-scaled)
# rows 0:32   lanes 384:416 : Wo
# rows 0:32   lanes 512:576 : W1
# rows 0:32   lanes 640:656 : Wout
# rows 32:96  lanes   0: 32 : W2
# rows 32:96  lanes 128:160 : mask_hv (64,32)  [c//16 == lane//8]  (V mask + denom matmul)
# rows 32:48  lanes 256:320 : mask_p  (16,64)  [key batch == query batch]
# rows 48:50  lanes 256:272 : pool    ( 2,16)  per-batch mean-pool matrix (1/S folded in)
# rows 64:96  lanes 256:320 : mask_k  (32,64)  [head(row) == c//16]
WP_ROWS = D + HIDDEN          # 96
WP_COLS = 6 * LB              # 768
WQKV_L = 0
WO_L = 3 * LB
W1_L = 4 * LB
WOUT_L = 5 * LB
W2_R = D
MHV_R = D
MP_R = D
POOL_R = D + BS               # 48 (multiple of 8 -> tile-aligned row slice)
MK_R = 2 * D                  # 64
CONST_L = 2 * LB              # lane block holding mask_p / pool / mask_k

# ---- packed bias / LayerNorm vector layout: (1, VEC_COLS) f32, 128-lane aligned ----
LN1W_L, LN1B_L, LN2W_L, LN2B_L = 0, LB, 2 * LB, 3 * LB
BQKV_L = 4 * LB               # 3 lane blocks: bq*SCALE | bk | bv
BO_L = 7 * LB
B1_L = 8 * LB
B2_L = 9 * LB
BOUT_L = 10 * LB
VEC_COLS = 11 * LB            # 1408


def _layer_norm(x, w, b):
    # mean and mean-of-squares are independent lane reductions (shorter chain than the
    # centered two-pass variance); values are O(1) so the cancellation is harmless.
    mu = jnp.mean(x, axis=-1, keepdims=True)
    ms = jnp.mean(x * x, axis=-1, keepdims=True)
    var = ms - mu * mu
    return (x - mu) * jax.lax.rsqrt(var + EPS) * w + b


def _erf(x):
    # Abramowitz & Stegun 7.1.26 approximation (abs err ~1.5e-7), Estrin-split
    # polynomial; the divide rides the EUP via pl.reciprocal.
    # TODO(synk): Mosaic has no native erf; exact-GELU uses this polynomial erf.
    p = 0.3275911
    a1, a2, a3, a4, a5 = (0.254829592, -0.284496736, 1.421413741,
                          -1.453152027, 1.061405429)
    sgn = jnp.where(x >= 0.0, 1.0, -1.0)
    ax = jnp.abs(x)
    t = pl.reciprocal(1.0 + p * ax, approx=False)
    t2 = t * t
    t3 = t2 * t
    e_lo = a1 + a2 * t
    e_hi = (a3 + a4 * t) + a5 * t2
    poly = t * e_lo + t3 * e_hi
    return sgn * (1.0 - poly * jnp.exp(-ax * ax))


def transformer_kernel(x_ref, wp_ref, vec_ref, out_ref):
    x = x_ref[...]                                            # (16, 32)

    # ---- 128-lane / 8-sublane aligned static slices of the packed params (free) ----
    wqkv = wp_ref[0:D, WQKV_L:WQKV_L + 3 * LB]                # (32, 384)
    wo = wp_ref[0:D, WO_L:WO_L + D]                           # (32, 32)
    w1 = wp_ref[0:D, W1_L:W1_L + HIDDEN]                      # (32, 64)
    wout = wp_ref[0:D, WOUT_L:WOUT_L + OUT_DIM]               # (32, 16)
    w2 = wp_ref[W2_R:W2_R + HIDDEN, 0:D]                      # (64, 32)
    mask_hv = wp_ref[MHV_R:MHV_R + SC, LB:LB + D]             # (64, 32)
    mask_p = wp_ref[MP_R:MP_R + BS, CONST_L:CONST_L + SC]     # (16, 64)
    pool = wp_ref[POOL_R:POOL_R + B, CONST_L:CONST_L + BS]    # ( 2, 16)
    mask_k = wp_ref[MK_R:MK_R + D, CONST_L:CONST_L + SC]      # (32, 64)

    ln1w = vec_ref[:, LN1W_L:LN1W_L + D]
    ln1b = vec_ref[:, LN1B_L:LN1B_L + D]
    ln2w = vec_ref[:, LN2W_L:LN2W_L + D]
    ln2b = vec_ref[:, LN2B_L:LN2B_L + D]
    bqkv = vec_ref[:, BQKV_L:BQKV_L + 3 * LB]                 # (1, 384)
    bo = vec_ref[:, BO_L:BO_L + D]
    b1 = vec_ref[:, B1_L:B1_L + HIDDEN]
    b2 = vec_ref[:, B2_L:B2_L + D]
    bout = vec_ref[:, BOUT_L:BOUT_L + OUT_DIM]

    # ---- attention block (pre-LN, residual); dropout = identity ----
    xn = _layer_norm(x, ln1w, ln1b)
    qkv = jnp.dot(xn, wqkv, preferred_element_type=jnp.float32) + bqkv   # (16, 384)
    q = qkv[:, 0:D]                 # (16, 32); 1/sqrt(head_dim) folded into Wq/bq
    k = qkv[:, LB:LB + D]           # (16, 32)
    v = qkv[:, 2 * LB:2 * LB + D]   # (16, 32)

    # All-(batch, head) attention in 3 MXU pushes via block-structured operands.
    # Score column layout: c = h*16 + b*8 + j  (head-major, then batch, then key).
    kt = k.T                                                        # (32, 16) single hoisted transpose
    kt_big = jnp.concatenate([kt, kt, kt, kt], axis=1) * mask_k     # (32, 64)
    v_big = jnp.concatenate([v, v, v, v], axis=0) * mask_hv         # (64, 32)

    scores = jnp.dot(q, kt_big, preferred_element_type=jnp.float32)  # (16, 64)
    p = jnp.exp(scores) * mask_p            # unnormalized probs, cross-batch cols zeroed
    num = jnp.dot(p, v_big, preferred_element_type=jnp.float32)      # (16, 32)
    den = jnp.dot(p, mask_hv, preferred_element_type=jnp.float32)    # (16, 32) per-head row-sums
    attn = num * pl.reciprocal(den, approx=False)                    # deferred softmax normalize

    x1 = x + jnp.dot(attn, wo, preferred_element_type=jnp.float32) + bo

    # ---- feed-forward block (pre-LN, residual); dropout = identity ----
    xn2 = _layer_norm(x1, ln2w, ln2b)
    h1 = jnp.dot(xn2, w1, preferred_element_type=jnp.float32) + b1       # (16, 64)
    g = 0.5 * h1 * (1.0 + _erf(h1 * INV_SQRT2))                          # exact GELU
    x2 = x1 + jnp.dot(g, w2, preferred_element_type=jnp.float32) + b2    # (16, 32)

    # ---- per-batch mean pool as a constant matmul + output projection ----
    pooled = jnp.dot(pool, x2, preferred_element_type=jnp.float32)       # (2, 32)
    out_ref[...] = jnp.dot(pooled, wout, preferred_element_type=jnp.float32) + bout


def pack_params(p):
    """Pack all parameters + constant mask/pool matrices into 2 lane-aligned arrays."""
    wpack = np.zeros((WP_ROWS, WP_COLS), np.float32)
    wqkv = np.asarray(p['wqkv_t'], np.float32)
    wpack[0:D, 0 * LB:0 * LB + D] = wqkv[:, 0:D] * SCALE          # Wq (scale folded)
    wpack[0:D, 1 * LB:1 * LB + D] = wqkv[:, D:2 * D]              # Wk
    wpack[0:D, 2 * LB:2 * LB + D] = wqkv[:, 2 * D:3 * D]          # Wv
    wpack[0:D, WO_L:WO_L + D] = np.asarray(p['wo_t'], np.float32)
    wpack[0:D, W1_L:W1_L + HIDDEN] = np.asarray(p['w1_t'], np.float32)
    wpack[0:D, WOUT_L:WOUT_L + OUT_DIM] = np.asarray(p['wout_t'], np.float32)
    wpack[W2_R:W2_R + HIDDEN, 0:D] = np.asarray(p['w2_t'], np.float32)

    # constant block-structure matrices (score column c = h*BS + b*S + j)
    c = np.arange(SC)
    d_i = np.arange(D)
    r_i = np.arange(BS)
    mask_k = (d_i[:, None] // HEAD_DIM == c[None, :] // BS).astype(np.float32)    # (32, 64)
    mask_hv = (c[:, None] // BS == d_i[None, :] // HEAD_DIM).astype(np.float32)   # (64, 32)
    mask_p = ((c[None, :] % BS) // S == r_i[:, None] // S).astype(np.float32)     # (16, 64)
    pool = (np.arange(B)[:, None] == r_i[None, :] // S).astype(np.float32) / S    # ( 2, 16)
    wpack[MHV_R:MHV_R + SC, LB:LB + D] = mask_hv
    wpack[MP_R:MP_R + BS, CONST_L:CONST_L + SC] = mask_p
    wpack[POOL_R:POOL_R + B, CONST_L:CONST_L + BS] = pool
    wpack[MK_R:MK_R + D, CONST_L:CONST_L + SC] = mask_k

    vecs = np.zeros((1, VEC_COLS), np.float32)
    vecs[:, LN1W_L:LN1W_L + D] = np.asarray(p['ln1_w'], np.float32)
    vecs[:, LN1B_L:LN1B_L + D] = np.asarray(p['ln1_b'], np.float32)
    vecs[:, LN2W_L:LN2W_L + D] = np.asarray(p['ln2_w'], np.float32)
    vecs[:, LN2B_L:LN2B_L + D] = np.asarray(p['ln2_b'], np.float32)
    bqkv = np.asarray(p['bqkv'], np.float32)
    vecs[:, BQKV_L + 0 * LB:BQKV_L + 0 * LB + D] = bqkv[:, 0:D] * SCALE
    vecs[:, BQKV_L + 1 * LB:BQKV_L + 1 * LB + D] = bqkv[:, D:2 * D]
    vecs[:, BQKV_L + 2 * LB:BQKV_L + 2 * LB + D] = bqkv[:, 2 * D:3 * D]
    vecs[:, BO_L:BO_L + D] = np.asarray(p['bo'], np.float32)
    vecs[:, B1_L:B1_L + HIDDEN] = np.asarray(p['b1'], np.float32)
    vecs[:, B2_L:B2_L + D] = np.asarray(p['b2'], np.float32)
    vecs[:, BOUT_L:BOUT_L + OUT_DIM] = np.asarray(p['bout'], np.float32)
    return jnp.asarray(wpack), jnp.asarray(vecs)


@jax.jit
def transformer_forward(x, wpack, vecs):
    x2d = x.reshape(B * S, D)
    # Single program, no grid: total resident footprint (~300 KiB) is far below any
    # generation's VMEM, and dropping the grid removes all per-step pipeline
    # bookkeeping for this latency-bound microkernel.
    return pl.pallas_call(
        transformer_kernel,
        out_shape=jax.ShapeDtypeStruct((B, OUT_DIM), jnp.float32),
    )(x2d, wpack, vecs)


def reference(x, p):
    """Pure-JAX replica of the PyTorch forward (eval mode)."""
    def ln(v, w, b):
        mu = v.mean(-1, keepdims=True)
        var = ((v - mu) ** 2).mean(-1, keepdims=True)
        return (v - mu) / jnp.sqrt(var + EPS) * w + b

    xn = ln(x, p['ln1_w'], p['ln1_b'])
    qkv = xn @ p['wqkv_t'] + p['bqkv']
    qkv = qkv.reshape(B, S, 3, NUM_HEADS, HEAD_DIM).transpose(2, 0, 3, 1, 4)
    q, k, v = qkv[0], qkv[1], qkv[2]
    attn = jnp.einsum('bhqd,bhkd->bhqk', q, k) * SCALE
    attn = jax.nn.softmax(attn, axis=-1)
    o = jnp.einsum('bhqk,bhkd->bhqd', attn, v)
    o = o.transpose(0, 2, 1, 3).reshape(B, S, D)
    o = o @ p['wo_t'] + p['bo']
    x1 = x + o
    xn2 = ln(x1, p['ln2_w'], p['ln2_b'])
    h = jax.nn.gelu(xn2 @ p['w1_t'] + p['b1'], approximate=False)
    ff = h @ p['w2_t'] + p['b2']
    x2 = x1 + ff
    pooled = x2.mean(axis=1)
    return pooled @ p['wout_t'] + p['bout']


def init_params(key):
    ks = jax.random.split(key, 16)
    n = lambda k, shape, s: (jax.random.normal(k, shape, jnp.float32) * s)
    params = {
        # LayerNorm affine params (stored as (1, D) so they are 2-D).
        'ln1_w': 1.0 + n(ks[0], (1, D), 0.05),
        'ln1_b': n(ks[1], (1, D), 0.05),
        'ln2_w': 1.0 + n(ks[2], (1, D), 0.05),
        'ln2_b': n(ks[3], (1, D), 0.05),
        # Linear weights, pre-transposed to (in, out) so kernels do x @ W.
        'wqkv_t': n(ks[4], (D, 3 * D), 1.0 / math.sqrt(D)),
        'bqkv':   n(ks[5], (1, 3 * D), 0.02),
        'wo_t':   n(ks[6], (D, D), 1.0 / math.sqrt(D)),
        'bo':     n(ks[7], (1, D), 0.02),
        'w1_t':   n(ks[8], (D, HIDDEN), 1.0 / math.sqrt(D)),
        'b1':     n(ks[9], (1, HIDDEN), 0.02),
        'w2_t':   n(ks[10], (HIDDEN, D), 1.0 / math.sqrt(HIDDEN)),
        'b2':     n(ks[11], (1, D), 0.02),
        'wout_t': n(ks[12], (D, OUT_DIM), 1.0 / math.sqrt(D)),
        'bout':   n(ks[13], (1, OUT_DIM), 0.02),
    }
    return params


if __name__ == "__main__":
    key = jax.random.PRNGKey(0)
    pkey, xkey = jax.random.split(key)
    params = init_params(pkey)
    x = jax.random.normal(xkey, (B, S, D), jnp.float32)

    wpack, vecs = pack_params(params)          # done once, outside the hot path
    y = transformer_forward(x, wpack, vecs)
    jax.block_until_ready(y)

    y_ref = reference(x, params)
    assert y.shape == (B, OUT_DIM)
    assert jnp.allclose(y, y_ref, atol=1e-4, rtol=1e-4), (
        f"max abs err {jnp.max(jnp.abs(y - y_ref))}")

    print("KERNEL_OK")
</pallas_src>

<mosaic_0001>
module attributes {stable_mosaic.version = 11 : i64} {
  func.func @transformer_kernel(%arg0: memref<16x32xf32, #tpu.memory_space<vmem>>, %arg1: memref<96x768xf32, #tpu.memory_space<vmem>>, %arg2: memref<1x1408xf32, #tpu.memory_space<vmem>>, %arg3: memref<2x16xf32, #tpu.memory_space<vmem>>) attributes {dimension_semantics = [], scalar_prefetch = 0 : i64, scratch_operands = 0 : i64, tpu.core_type = #tpu.core_type<tc>} {
    %c0 = arith.constant 0 : index
    %c0_0 = arith.constant 0 : index
    %0 = vector.load %arg0[%c0, %c0_0] : memref<16x32xf32, #tpu.memory_space<vmem>>, vector<16x32xf32>
    %c0_1 = arith.constant 0 : index
    %c0_2 = arith.constant 0 : index
    %1 = vector.load %arg1[%c0_1, %c0_2] : memref<96x768xf32, #tpu.memory_space<vmem>>, vector<32x384xf32>
    %c0_3 = arith.constant 0 : index
    %c384 = arith.constant 384 : index
    %2 = vector.load %arg1[%c0_3, %c384] : memref<96x768xf32, #tpu.memory_space<vmem>>, vector<32x32xf32>
    %c0_4 = arith.constant 0 : index
    %c512 = arith.constant 512 : index
    %3 = vector.load %arg1[%c0_4, %c512] : memref<96x768xf32, #tpu.memory_space<vmem>>, vector<32x64xf32>
    %c0_5 = arith.constant 0 : index
    %c640 = arith.constant 640 : index
    %4 = vector.load %arg1[%c0_5, %c640] : memref<96x768xf32, #tpu.memory_space<vmem>>, vector<32x16xf32>
    %c32 = arith.constant 32 : index
    %c0_6 = arith.constant 0 : index
    %5 = vector.load %arg1[%c32, %c0_6] : memref<96x768xf32, #tpu.memory_space<vmem>>, vector<64x32xf32>
    %c32_7 = arith.constant 32 : index
    %c128 = arith.constant 128 : index
    %6 = vector.load %arg1[%c32_7, %c128] : memref<96x768xf32, #tpu.memory_space<vmem>>, vector<64x32xf32>
    %c32_8 = arith.constant 32 : index
    %c256 = arith.constant 256 : index
    %7 = vector.load %arg1[%c32_8, %c256] : memref<96x768xf32, #tpu.memory_space<vmem>>, vector<16x64xf32>
    %c48 = arith.constant 48 : index
    %c256_9 = arith.constant 256 : index
    %8 = vector.load %arg1[%c48, %c256_9] : memref<96x768xf32, #tpu.memory_space<vmem>>, vector<2x16xf32>
    %c64 = arith.constant 64 : index
    %c256_10 = arith.constant 256 : index
    %9 = vector.load %arg1[%c64, %c256_10] : memref<96x768xf32, #tpu.memory_space<vmem>>, vector<32x64xf32>
    %c0_11 = arith.constant 0 : index
    %c0_12 = arith.constant 0 : index
    %10 = vector.load %arg2[%c0_11, %c0_12] : memref<1x1408xf32, #tpu.memory_space<vmem>>, vector<1x32xf32>
    %c0_13 = arith.constant 0 : index
    %c128_14 = arith.constant 128 : index
    %11 = vector.load %arg2[%c0_13, %c128_14] : memref<1x1408xf32, #tpu.memory_space<vmem>>, vector<1x32xf32>
    %c0_15 = arith.constant 0 : index
    %c256_16 = arith.constant 256 : index
    %12 = vector.load %arg2[%c0_15, %c256_16] : memref<1x1408xf32, #tpu.memory_space<vmem>>, vector<1x32xf32>
    %c0_17 = arith.constant 0 : index
    %c384_18 = arith.constant 384 : index
    %13 = vector.load %arg2[%c0_17, %c384_18] : memref<1x1408xf32, #tpu.memory_space<vmem>>, vector<1x32xf32>
    %c0_19 = arith.constant 0 : index
    %c512_20 = arith.constant 512 : index
    %14 = vector.load %arg2[%c0_19, %c512_20] : memref<1x1408xf32, #tpu.memory_space<vmem>>, vector<1x384xf32>
    %c0_21 = arith.constant 0 : index
    %c896 = arith.constant 896 : index
    %15 = vector.load %arg2[%c0_21, %c896] : memref<1x1408xf32, #tpu.memory_space<vmem>>, vector<1x32xf32>
    %c0_22 = arith.constant 0 : index
    %c1024 = arith.constant 1024 : index
    %16 = vector.load %arg2[%c0_22, %c1024] : memref<1x1408xf32, #tpu.memory_space<vmem>>, vector<1x64xf32>
    %c0_23 = arith.constant 0 : index
    %c1152 = arith.constant 1152 : index
    %17 = vector.load %arg2[%c0_23, %c1152] : memref<1x1408xf32, #tpu.memory_space<vmem>>, vector<1x32xf32>
    %c0_24 = arith.constant 0 : index
    %c1280 = arith.constant 1280 : index
    %18 = vector.load %arg2[%c0_24, %c1280] : memref<1x1408xf32, #tpu.memory_space<vmem>>, vector<1x16xf32>
    %cst = arith.constant dense<0.000000e+00> : vector<16xf32>
    %19 = vector.multi_reduction <add>, %0, %cst [1] : vector<16x32xf32> to vector<16xf32>
    %20 = vector.shape_cast %19 : vector<16xf32> to vector<16x1xf32>
    %cst_25 = arith.constant 3.200000e+01 : f32
    %21 = vector.broadcast %cst_25 : f32 to vector<16x1xf32>
    %22 = arith.divf %20, %21 : vector<16x1xf32>
    %23 = arith.mulf %0, %0 : vector<16x32xf32>
    %cst_26 = arith.constant dense<0.000000e+00> : vector<16xf32>
    %24 = vector.multi_reduction <add>, %23, %cst_26 [1] : vector<16x32xf32> to vector<16xf32>
    %25 = vector.shape_cast %24 : vector<16xf32> to vector<16x1xf32>
    %cst_27 = arith.constant 3.200000e+01 : f32
    %26 = vector.broadcast %cst_27 : f32 to vector<16x1xf32>
    %27 = arith.divf %25, %26 : vector<16x1xf32>
    %28 = arith.mulf %22, %22 : vector<16x1xf32>
    %29 = arith.subf %27, %28 : vector<16x1xf32>
    %30 = vector.broadcast %22 : vector<16x1xf32> to vector<16x32xf32>
    %31 = arith.subf %0, %30 : vector<16x32xf32>
    %cst_28 = arith.constant 9.99999974E-6 : f32
    %32 = vector.broadcast %cst_28 : f32 to vector<16x1xf32>
    %33 = arith.addf %29, %32 : vector<16x1xf32>
    %34 = math.rsqrt %33 : vector<16x1xf32>
    %35 = vector.broadcast %34 : vector<16x1xf32> to vector<16x32xf32>
    %36 = arith.mulf %31, %35 : vector<16x32xf32>
    %37 = vector.broadcast %10 : vector<1x32xf32> to vector<16x32xf32>
    %38 = arith.mulf %36, %37 : vector<16x32xf32>
    %39 = vector.broadcast %11 : vector<1x32xf32> to vector<16x32xf32>
    %40 = arith.addf %38, %39 : vector<16x32xf32>
    %cst_29 = arith.constant dense<0.000000e+00> : vector<16x384xf32>
    %41 = tpu.matmul %40, %1, %cst_29 {dimension_numbers = #tpu.dot_dimension_numbers<[1], [0], [0], [1], [0, 0, 1, 1], [], []>} : vector<16x32xf32>, vector<32x384xf32>, vector<16x384xf32> -> vector<16x384xf32>
    %42 = vector.broadcast %14 : vector<1x384xf32> to vector<16x384xf32>
    %43 = arith.addf %41, %42 : vector<16x384xf32>
    %44 = vector.extract_strided_slice %43 {offsets = [0, 0], sizes = [16, 32], strides = [1, 1]} : vector<16x384xf32> to vector<16x32xf32>
    %45 = vector.extract_strided_slice %43 {offsets = [0, 128], sizes = [16, 32], strides = [1, 1]} : vector<16x384xf32> to vector<16x32xf32>
    %46 = vector.extract_strided_slice %43 {offsets = [0, 256], sizes = [16, 32], strides = [1, 1]} : vector<16x384xf32> to vector<16x32xf32>
    %47 = tpu.transpose %45, [1, 0] : vector<16x32xf32> -> vector<32x16xf32>
    %48 = tpu.concatenate %47, %47, %47, %47 in 1 : vector<32x16xf32>, vector<32x16xf32>, vector<32x16xf32>, vector<32x16xf32> -> vector<32x64xf32>
    %49 = arith.mulf %48, %9 : vector<32x64xf32>
    %50 = tpu.concatenate %46, %46, %46, %46 in 0 : vector<16x32xf32>, vector<16x32xf32>, vector<16x32xf32>, vector<16x32xf32> -> vector<64x32xf32>
    %51 = arith.mulf %50, %6 : vector<64x32xf32>
    %cst_30 = arith.constant dense<0.000000e+00> : vector<16x64xf32>
    %52 = tpu.matmul %44, %49, %cst_30 {dimension_numbers = #tpu.dot_dimension_numbers<[1], [0], [0], [1], [0, 0, 1, 1], [], []>} : vector<16x32xf32>, vector<32x64xf32>, vector<16x64xf32> -> vector<16x64xf32>
    %53 = math.exp %52 : vector<16x64xf32>
    %54 = arith.mulf %53, %7 : vector<16x64xf32>
    %cst_31 = arith.constant dense<0.000000e+00> : vector<16x32xf32>
    %55 = tpu.matmul %54, %51, %cst_31 {dimension_numbers = #tpu.dot_dimension_numbers<[1], [0], [0], [1], [0, 0, 1, 1], [], []>} : vector<16x64xf32>, vector<64x32xf32>, vector<16x32xf32> -> vector<16x32xf32>
    %cst_32 = arith.constant dense<0.000000e+00> : vector<16x32xf32>
    %56 = tpu.matmul %54, %6, %cst_32 {dimension_numbers = #tpu.dot_dimension_numbers<[1], [0], [0], [1], [0, 0, 1, 1], [], []>} : vector<16x64xf32>, vector<64x32xf32>, vector<16x32xf32> -> vector<16x32xf32>
    %57 = tpu.reciprocal %56 : vector<16x32xf32> -> vector<16x32xf32>
    %58 = arith.mulf %55, %57 : vector<16x32xf32>
    %cst_33 = arith.constant dense<0.000000e+00> : vector<16x32xf32>
    %59 = tpu.matmul %58, %2, %cst_33 {dimension_numbers = #tpu.dot_dimension_numbers<[1], [0], [0], [1], [0, 0, 1, 1], [], []>} : vector<16x32xf32>, vector<32x32xf32>, vector<16x32xf32> -> vector<16x32xf32>
    %60 = arith.addf %0, %59 : vector<16x32xf32>
    %61 = vector.broadcast %15 : vector<1x32xf32> to vector<16x32xf32>
    %62 = arith.addf %60, %61 : vector<16x32xf32>
    %cst_34 = arith.constant dense<0.000000e+00> : vector<16xf32>
    %63 = vector.multi_reduction <add>, %62, %cst_34 [1] : vector<16x32xf32> to vector<16xf32>
    %64 = vector.shape_cast %63 : vector<16xf32> to vector<16x1xf32>
    %cst_35 = arith.constant 3.200000e+01 : f32
    %65 = vector.broadcast %cst_35 : f32 to vector<16x1xf32>
    %66 = arith.divf %64, %65 : vector<16x1xf32>
    %67 = arith.mulf %62, %62 : vector<16x32xf32>
    %cst_36 = arith.constant dense<0.000000e+00> : vector<16xf32>
    %68 = vector.multi_reduction <add>, %67, %cst_36 [1] : vector<16x32xf32> to vector<16xf32>
    %69 = vector.shape_cast %68 : vector<16xf32> to vector<16x1xf32>
    %cst_37 = arith.constant 3.200000e+01 : f32
    %70 = vector.broadcast %cst_37 : f32 to vector<16x1xf32>
    %71 = arith.divf %69, %70 : vector<16x1xf32>
    %72 = arith.mulf %66, %66 : vector<16x1xf32>
    %73 = arith.subf %71, %72 : vector<16x1xf32>
    %74 = vector.broadcast %66 : vector<16x1xf32> to vector<16x32xf32>
    %75 = arith.subf %62, %74 : vector<16x32xf32>
    %cst_38 = arith.constant 9.99999974E-6 : f32
    %76 = vector.broadcast %cst_38 : f32 to vector<16x1xf32>
    %77 = arith.addf %73, %76 : vector<16x1xf32>
    %78 = math.rsqrt %77 : vector<16x1xf32>
    %79 = vector.broadcast %78 : vector<16x1xf32> to vector<16x32xf32>
    %80 = arith.mulf %75, %79 : vector<16x32xf32>
    %81 = vector.broadcast %12 : vector<1x32xf32> to vector<16x32xf32>
    %82 = arith.mulf %80, %81 : vector<16x32xf32>
    %83 = vector.broadcast %13 : vector<1x32xf32> to vector<16x32xf32>
    %84 = arith.addf %82, %83 : vector<16x32xf32>
    %cst_39 = arith.constant dense<0.000000e+00> : vector<16x64xf32>
    %85 = tpu.matmul %84, %3, %cst_39 {dimension_numbers = #tpu.dot_dimension_numbers<[1], [0], [0], [1], [0, 0, 1, 1], [], []>} : vector<16x32xf32>, vector<32x64xf32>, vector<16x64xf32> -> vector<16x64xf32>
    %86 = vector.broadcast %16 : vector<1x64xf32> to vector<16x64xf32>
    %87 = arith.addf %85, %86 : vector<16x64xf32>
    %cst_40 = arith.constant 5.000000e-01 : f32
    %88 = vector.broadcast %cst_40 : f32 to vector<16x64xf32>
    %89 = arith.mulf %88, %87 : vector<16x64xf32>
    %cst_41 = arith.constant 0.707106769 : f32
    %90 = vector.broadcast %cst_41 : f32 to vector<16x64xf32>
    %91 = arith.mulf %87, %90 : vector<16x64xf32>
    %cst_42 = arith.constant 0.000000e+00 : f32
    %92 = vector.broadcast %cst_42 : f32 to vector<16x64xf32>
    %93 = arith.cmpf oge, %91, %92 : vector<16x64xf32>
    %cst_43 = arith.constant 1.000000e+00 : f32
    %cst_44 = arith.constant -1.000000e+00 : f32
    %94 = vector.broadcast %cst_43 : f32 to vector<16x64xf32>
    %95 = vector.broadcast %cst_44 : f32 to vector<16x64xf32>
    %96 = arith.select %93, %94, %95 : vector<16x64xi1>, vector<16x64xf32>
    %97 = math.absf %91 : vector<16x64xf32>
    %cst_45 = arith.constant 0.327591091 : f32
    %98 = vector.broadcast %cst_45 : f32 to vector<16x64xf32>
    %99 = arith.mulf %98, %97 : vector<16x64xf32>
    %cst_46 = arith.constant 1.000000e+00 : f32
    %100 = vector.broadcast %cst_46 : f32 to vector<16x64xf32>
    %101 = arith.addf %100, %99 : vector<16x64xf32>
    %102 = tpu.reciprocal %101 : vector<16x64xf32> -> vector<16x64xf32>
    %103 = arith.mulf %102, %102 : vector<16x64xf32>
    %104 = arith.mulf %103, %102 : vector<16x64xf32>
    %cst_47 = arith.constant -0.284496725 : f32
    %105 = vector.broadcast %cst_47 : f32 to vector<16x64xf32>
    %106 = arith.mulf %105, %102 : vector<16x64xf32>
    %cst_48 = arith.constant 0.254829586 : f32
    %107 = vector.broadcast %cst_48 : f32 to vector<16x64xf32>
    %108 = arith.addf %107, %106 : vector<16x64xf32>
    %cst_49 = arith.constant -1.45315206 : f32
    %109 = vector.broadcast %cst_49 : f32 to vector<16x64xf32>
    %110 = arith.mulf %109, %102 : vector<16x64xf32>
    %cst_50 = arith.constant 1.42141378 : f32
    %111 = vector.broadcast %cst_50 : f32 to vector<16x64xf32>
    %112 = arith.addf %111, %110 : vector<16x64xf32>
    %cst_51 = arith.constant 1.06140542 : f32
    %113 = vector.broadcast %cst_51 : f32 to vector<16x64xf32>
    %114 = arith.mulf %113, %103 : vector<16x64xf32>
    %115 = arith.addf %112, %114 : vector<16x64xf32>
    %116 = arith.mulf %102, %108 : vector<16x64xf32>
    %117 = arith.mulf %104, %115 : vector<16x64xf32>
    %118 = arith.addf %116, %117 : vector<16x64xf32>
    %cst_52 = arith.constant 0.000000e+00 : f32
    %119 = vector.broadcast %cst_52 : f32 to vector<16x64xf32>
    %120 = arith.subf %119, %97 : vector<16x64xf32>
    %121 = arith.mulf %120, %97 : vector<16x64xf32>
    %122 = math.exp %121 : vector<16x64xf32>
    %123 = arith.mulf %118, %122 : vector<16x64xf32>
    %cst_53 = arith.constant 1.000000e+00 : f32
    %124 = vector.broadcast %cst_53 : f32 to vector<16x64xf32>
    %125 = arith.subf %124, %123 : vector<16x64xf32>
    %126 = arith.mulf %96, %125 : vector<16x64xf32>
    %cst_54 = arith.constant 1.000000e+00 : f32
    %127 = vector.broadcast %cst_54 : f32 to vector<16x64xf32>
    %128 = arith.addf %127, %126 : vector<16x64xf32>
    %129 = arith.mulf %89, %128 : vector<16x64xf32>
    %cst_55 = arith.constant dense<0.000000e+00> : vector<16x32xf32>
    %130 = tpu.matmul %129, %5, %cst_55 {dimension_numbers = #tpu.dot_dimension_numbers<[1], [0], [0], [1], [0, 0, 1, 1], [], []>} : vector<16x64xf32>, vector<64x32xf32>, vector<16x32xf32> -> vector<16x32xf32>
    %131 = arith.addf %62, %130 : vector<16x32xf32>
    %132 = vector.broadcast %17 : vector<1x32xf32> to vector<16x32xf32>
    %133 = arith.addf %131, %132 : vector<16x32xf32>
    %cst_56 = arith.constant dense<0.000000e+00> : vector<2x32xf32>
    %134 = tpu.matmul %8, %133, %cst_56 {dimension_numbers = #tpu.dot_dimension_numbers<[1], [0], [0], [1], [0, 0, 1, 1], [], []>} : vector<2x16xf32>, vector<16x32xf32>, vector<2x32xf32> -> vector<2x32xf32>
    %cst_57 = arith.constant dense<0.000000e+00> : vector<2x16xf32>
    %135 = tpu.matmul %134, %4, %cst_57 {dimension_numbers = #tpu.dot_dimension_numbers<[1], [0], [0], [1], [0, 0, 1, 1], [], []>} : vector<2x32xf32>, vector<32x16xf32>, vector<2x16xf32> -> vector<2x16xf32>
    %136 = vector.broadcast %18 : vector<1x16xf32> to vector<2x16xf32>
    %137 = arith.addf %135, %136 : vector<2x16xf32>
    %c0_58 = arith.constant 0 : index
    %c0_59 = arith.constant 0 : index
    %138 = vector.load %arg3[%c0_58, %c0_59] : memref<2x16xf32, #tpu.memory_space<vmem>>, vector<2x16xf32>
    tpu.vector_store %arg3[%c0_58, %c0_59], %137 {strides = array<i32>} : memref<2x16xf32, #tpu.memory_space<vmem>>, vector<2x16xf32>,
    return
  }
}

</mosaic_0001>

<bundles_post_ra>
// kernel: transformer_forward.1
= control target key start
LH: loop header
LB: loop body
LE: loop exit
PB: predicated region body
PF: predicated region fallthrough
CT: control target
= control target key end

     0   :  { %8 = vsyncpa [#allocation3], 0  ;;  %s1831_s0 = inlined_call_operand.hbm [shape: f32[16,32], index: 0, kind: input, shape index: {}]   ;;  %s1832_s1 = inlined_call_operand.hbm [shape: f32[96,768], index: 1, kind: input, shape index: {}]   ;;  %s1833_s2 = inlined_call_operand.vmem [shape: f32[1,1408], index: 2, kind: input, shape index: {}]   ;;  %s1834_s3 = inlined_call_operand.hbm [shape: f32[2,16], index: 3, kind: output, shape index: {}]  }
   0x1   :  { %9 = vsyncpa [#allocation6], 0 }
   0x2   :  { %10 = vsyncpa [#allocation4], 0  ;;  %s1623_s12 = smov [#allocation2]   ;;  %s1551_s16 = scalar_lea.hbm %s1831_s0, 256 }
   0x3   :  { %s16_s13 = sshll.u32 %s1623_s12, 4  ;;  %p1552_p0 = scmp.ne.s32.totalorder %s1831_s0, %s1551_s16  ;;  %s17_s13 = int_to_ptr.vmem [resolvable:$true] %s16_s13 }
   0x4   :  { %p1555_p1 = scmp.lt.u32.totalorder %s1551_s16, %s1831_s0 }
   0x6   :  { %p1557_p2 = pnand %p1555_p1, %p1552_p0 }
   0x8   :  { %1560 = shalt.err (!%p1557_p2)
}
   0x9   :  { %s1561_s21 = scalar_lea.vmem %s17_s13, 256  ;;  %p1566_p4 = scmp.lt.s32.totalorder %s17_s13, %s17_s13 }
   0xa   :  { %p1562_p3 = scmp.ne.s32.totalorder %s17_s13, %s1561_s21  ;;  %p1567_p5 = scmp.lt.s32.totalorder %s1561_s21, %s1561_s21 }
   0xc   :  { %p1568_p6 = por %p1567_p5, %p1566_p4 }
   0xe   :  { %p1569_p7 = pnand %p1568_p6, %p1562_p3 }
  0x10   :  { %1572 = shalt.err (!%p1569_p7)
}
  0x11   :  { %s1624_s22 = smov 128   ;;  %s1625_s23 = smov 8  }
  0x12   :  { %22 = dma.hbm_to_vmem [thread:$0]  %s1831_s0, 256, %s17_s13, [#allocation3], %s1624_s22, %s1624_s22, %s1625_s23  }
  0x13   :  { %s1626_s26 = smov [#allocation5]   ;;  %s1573_s30 = scalar_lea.hbm %s1832_s1, 9216 }
  0x14   :  { %s28_s27 = sshll.u32 %s1626_s26, 4  ;;  %p1574_p8 = scmp.ne.s32.totalorder %s1832_s1, %s1573_s30  ;;  %s29_s27 = int_to_ptr.vmem [resolvable:$true] %s28_s27 }
  0x15   :  { %p1577_p9 = scmp.lt.u32.totalorder %s1573_s30, %s1832_s1 }
  0x17   :  { %p1579_p10 = pnand %p1577_p9, %p1574_p8 }
  0x19   :  { %1582 = shalt.err (!%p1579_p10)
}
  0x1a   :  { %s1583_s8 = scalar_lea.vmem %s29_s27, 9216  ;;  %p1588_p12 = scmp.lt.s32.totalorder %s29_s27, %s29_s27 }
  0x1b   :  { %p1584_p11 = scmp.ne.s32.totalorder %s29_s27, %s1583_s8  ;;  %p1589_p13 = scmp.lt.s32.totalorder %s1583_s8, %s1583_s8 }
  0x1d   :  { %p1590_p0 = por %p1589_p13, %p1588_p12 }
  0x1f   :  { %p1591_p1 = pnand %p1590_p0, %p1584_p11 }
  0x21   :  { %1594 = shalt.err (!%p1591_p1)
}
  0x22   :  { %s1627_s0 = smov 768   ;;  %s1628_s9 = smov 48  }
  0x23   :  { %34 = dma.hbm_to_vmem [thread:$0]  %s1832_s1, 9216, %s29_s27, [#allocation6], %s1627_s0, %s1627_s0, %s1628_s9  }
  0x24   :  { %1617 = dma.done.wait [#allocation3], 256  }
  0x25   :  { %1618 = vsyncadd [#allocation3], 4294967040 }
  0x26   :  { %1619 = dma.done.wait [#allocation6], 9216  }
  0x27   :  { %1620 = vsyncadd [#allocation6], 4294958080  ;;  %vm101_vm0 = vcmask 261120   ;;  %v1681_v0 = vld [vmem:[#allocation2 + $0x8] sm:$0xff]  ;;  %v1683_v1 = vld [vmem:[#allocation2] sm:$0xff]  ;;  %v1629_v15 = vmov 0.0   ;;  %v150_v53 = vlaneseq }
  0x28   :  { %v105_v2 = vsel %vm101_vm0, %v1681_v0, 0.0  ;;  %v102_v3 = vsel %vm101_vm0, %v1683_v1, 0.0  ;;  %v112_v4 = vmul.f32 %v1681_v0, %v1681_v0  ;;  %v111_v5 = vmul.f32 %v1683_v1, %v1683_v1  ;;  %v46_v8 = vld [vmem:[#allocation5 + $0x8] sm:$0xff]  ;;  %v49_v9 = vld [vmem:[#allocation5 + $0x38] sm:$0xff]  ;;  %v45_v10 = vld [vmem:[#allocation5] sm:$0xff]  ;;  %235 = vmatprep.mubr.f32.mxu0 %v1629_v15  ;;  %s1630_s17 = smov 16  }
  0x29   :  { %106 = vadd.xlane.f32.xlu1 %v105_v2  ;;  %103 = vadd.xlane.f32.xlu0 %v102_v3  ;;  %v1417_v11 = vpack.c.bf16 %v49_v9, %v46_v8  ;;  %v48_v12 = vld [vmem:[#allocation5 + $0x30] sm:$0xff]  ;;  %v50_v14 = vld [vmem:[#allocation5 + $0x40] sm:$0xff]  ;;  %v52_v18 = vld [vmem:[#allocation5 + $0x68] sm:$0xff]  ;;  %v151_v54 = vshrl.u32 %v150_v53, 7  ;;  %s1631_s18 = smov 32   ;;  %vm395_vm1 = vcmask 130048  }
  0x2a   :  { %v116_v6 = vsel %vm101_vm0, %v112_v4, 0.0  ;;  %v113_v7 = vsel %vm101_vm0, %v111_v5, 0.0  ;;  %v47_v13 = vld [vmem:[#allocation5 + $0x10] sm:$0xff]  ;;  %v1419_v16 = vpack.c.bf16 %v48_v12, %v45_v10  ;;  %v55_v19 = vld [vmem:[#allocation5 + $0x98] sm:$0xff]  ;;  %v51_v20 = vld [vmem:[#allocation5 + $0x60] sm:$0xff]  ;;  %vm404_vm2 = vcmask 392192  }
  0x2b   :  { %v1425_v17 = vpack.c.bf16 %v50_v14, %v47_v13  ;;  %1418 = vmatprep.subr.bf16.mxu0 %v1417_v11  ;;  %v1421_v21 = vpack.c.bf16 %v55_v19, %v52_v18  ;;  %v54_v22 = vld [vmem:[#allocation5 + $0x90] sm:$0xff]  ;;  %v56_v24 = vld [vmem:[#allocation5 + $0xa0] sm:$0xff]  ;;  %v152_v55 = vsub.s32 0, %v151_v54  ;;  %v156_v57 = vsub.s32 1, %v151_v54  ;;  %v1712_v63 = vld [vmem:[#allocation5 + $0xf8] sm:$0xff]  ;;  %s1635_s4 = smov [#allocation7]  }
  0x2c   :  { %v53_v23 = vld [vmem:[#allocation5 + $0x70] sm:$0xff]  ;;  %1420 = vmatpush1.bf16.msra.mxu0 %v1419_v16  ;;  %v1423_v25 = vpack.c.bf16 %v54_v22, %v51_v20  ;;  %v160_v58 = vsub.s32 2, %v151_v54  ;;  %v1714_v5 = vld [vmem:[#allocation5 + $0x158] sm:$0xff]  ;;  %v1720_v11 = vld [vmem:[#allocation5 + $0xc8] sm:$0xff]  ;;  %vm508_vm3 = vcmask 523264   ;;  %vm1634_vm6 = vmmov 0  }
  0x2d   :  { %117 = vadd.xlane.f32.xlu1 %v116_v6  ;;  %114 = vadd.xlane.f32.xlu0 %v113_v7  ;;  %v1429_v26 = vpack.c.bf16 %v56_v24, %v53_v23  ;;  %v1210_v44 = vld [vmem:[%s1833_s2] ss:$0 sm:$0xff]  ;;  %v1211_v47 = vld [vmem:[%s1833_s2 + $0x1] ss:$0 sm:$0xff]  ;;  %v96_v56 = vld [vmem:[%s1833_s2 + $0x4] sm:$0x7] }
  0x2e   :  { %1426 = vmatprep.subr.bf16.mxu1 %v1425_v17  ;;  %1422 = vmatprep.subr.bf16.mxu0 %v1421_v21  ;;  %v153_v59 = vrot.slane %v96_v56, %v152_v55  ;;  %v157_v60 = vrot.slane %v96_v56, %v156_v57  ;;  %v161_v61 = vrot.slane %v96_v56, %v160_v58  ;;  %v1716_v6 = vld [vmem:[#allocation5 + $0x1b8] sm:$0xff]  ;;  %v1722_v12 = vld [vmem:[#allocation5 + $0x128] sm:$0xff]  ;;  %s1200_s5 = sshll.u32 %s1635_s4, 4  ;;  %vm1192_vm7 = vcmask 123904   ;;  %s1201_s5 = int_to_ptr.vmem [resolvable:$true] %s1200_s5 }
  0x2f   :  { %1428 = vmatpush3.bf16.msra.mxu1 %v1425_v17  ;;  %v1718_v7 = vld [vmem:[#allocation5 + $0x218] sm:$0xff]  ;;  %v1724_v13 = vld [vmem:[#allocation5 + $0x188] sm:$0xff]  ;;  %s1595_s6 = scalar_lea.vmem %s1201_s5, 32  ;;  %p1600_p3 = scmp.lt.s32.totalorder %s1201_s5, %s1201_s5 }
  0x30   :  { %1430 = vmatprep.subr.bf16.mxu1 %v1429_v26  ;;  %1424 = vmatpush1.bf16.msra.mxu0 %v1423_v25  ;;  %v1727_v16 = vld [vmem:[#allocation5 + $0x1e8] sm:$0xff]  ;;  %p1596_p2 = scmp.ne.s32.totalorder %s1201_s5, %s1595_s6  ;;  %p1601_p4 = scmp.lt.s32.totalorder %s1595_s6, %s1595_s6 }
  0x32   :  { %p1602_p5 = por %p1601_p4, %p1600_p3 }
  0x33   :  { %1432 = vmatpush3.bf16.msra.mxu1 %v1429_v26 }
  0x34   :  { %p1603_p6 = pnand %p1602_p5, %p1596_p2 }
  0xb6   :  { %v107_v27 = vpop.xlane.xlu1 %106  ;;  %v104_v28 = vpop.xlane.xlu0 %103 }
  0xb7   :  { %v110_v29 = vmul.f32 0.03125, %v107_v27  ;;  %v109_v30 = vmul.f32 0.03125, %v104_v28 }
  0xb9   :  { %v122_v31 = vmul.f32 %v110_v29, %v110_v29  ;;  %v121_v34 = vmul.f32 %v109_v30, %v109_v30  ;;  %v126_v41 = vsub.f32 %v1681_v0, %v110_v29  ;;  %v125_v43 = vsub.f32 %v1683_v1, %v109_v30 }
  0xba   :  { %v118_v32 = vpop.xlane.xlu1 %117  ;;  %v115_v33 = vpop.xlane.xlu0 %114 }
  0xbb   :  { %v120_v35 = vmul.f32 0.03125, %v118_v32  ;;  %v119_v36 = vmul.f32 0.03125, %v115_v33 }
  0xbd   :  { %v124_v37 = vsub.f32 %v120_v35, %v122_v31  ;;  %v123_v38 = vsub.f32 %v119_v36, %v121_v34 }
  0xbf   :  { %v128_v39 = vadd.f32 1e-05, %v124_v37  ;;  %v127_v40 = vadd.f32 1e-05, %v123_v38 }
  0xc1   :  { %1527 = vrsqrt.f32 %v128_v39 }
  0xc2   :  { %1529 = vrsqrt.f32 %v127_v40 }
  0xcb   :  { %v1528_v42 = vpop.eup %1527 }
  0xcc   :  { %v1530_v45 = vpop.eup %1529  ;;  %v132_v46 = vmul.f32 %v1528_v42, %v126_v41 }
  0xcd   :  { %v131_v48 = vmul.f32 %v1530_v45, %v125_v43 }
  0xce   :  { %v140_v49 = vmul.f32 %v1210_v44, %v132_v46 }
  0xcf   :  { %v139_v50 = vmul.f32 %v1210_v44, %v131_v48  ;;  %v88_v44 = vld [vmem:[#allocation5 + $0x190] sm:$0xff] }
  0xd0   :  { %v148_v51 = vadd.f32 %v1211_v47, %v140_v49 }
  0xd1   :  { %v147_v52 = vadd.f32 %v1211_v47, %v139_v50  ;;  %v89_v47 = vld [vmem:[#allocation5 + $0x1c0] sm:$0xff] }
  0xd3   :  { %1212 = vmatmul.mubr.msk.f32.vlgmr.msra.gmra.mrb[0].mxu0 %vm101_vm0, %v147_v52  ;;  %1306 = vmatprep.mubr.msk.f32.mxu1 %vm101_vm0, %v147_v52 }
  0xd4   :  { %1307 = vmatmul.mubr.msk.f32.vlgmr.msra.gmra.mrb[0].mxu1 %vm101_vm0, %v148_v51  ;;  %241 = vmatprep.mubr.f32.mxu0 %v1629_v15 }
  0xd7   :  { %1213 = vmatmul.mubr.msk.f32.gmra.mrb[2].mxu0 %vm101_vm0, %v148_v51 }
 0x1a6   :  { %v237_v62 = vpop.f32.mrb[0].mxu0 }
 0x1a7   :  { %v238_v2 = vadd.f32 %v237_v62, %v153_v59  ;;  %v239_v3 = vpop.f32.mrb[1].mxu0  ;;  %v1308_v4 = vpop.f32.mrb[0].mxu1  ;;  %v90_v62 = vld [vmem:[#allocation5 + $0x1f0] sm:$0xff] }
 0x1a8   :  { %v240_v8 = vadd.f32 %v239_v3, %v157_v60  ;;  %v320_v9 = vadd.f32 %v1308_v4, %v161_v61  ;;  %v314_v10 = vpop.f32.mrb[1].mxu1  ;;  %v91_v3 = vld [vmem:[#allocation5 + $0x220] sm:$0xff] }
 0x1a9   :  { %v315_v14 = vadd.f32 %v314_v10, %v161_v61  ;;  %1317 = vmatprep.mubr.msk.f32.mxu0 %vm101_vm0, %v238_v2 }
 0x1aa   :  { %v243_v17 = vpop.f32.mrb[2].mxu0  ;;  %323 = vxpose.xlu0.b32.start [1/2] (short) (narrow) %v240_v8, 32  ;;  %v414_v18 = vmul.f32 %v320_v9, %v1712_v63  ;;  %v416_v19 = vmul.f32 %v320_v9, %v1714_v5  ;;  %v418_v20 = vmul.f32 %v320_v9, %v1716_v6  ;;  %v420_v21 = vmul.f32 %v320_v9, %v1718_v7 }
 0x1ab   :  { %v1733_v22 = vadd.f32 %v243_v17, %v153_v59  ;;  %v245_v23 = vpop.f32.mrb[3].mxu0  ;;  %v413_v24 = vmul.f32 %v315_v14, %v1720_v11  ;;  %v415_v25 = vmul.f32 %v315_v14, %v1722_v12  ;;  %v417_v26 = vmul.f32 %v315_v14, %v1724_v13 }
 0x1ac   :  { %v246_v27 = vadd.f32 %v245_v23, %v157_v60  ;;  %v419_v28 = vmul.f32 %v315_v14, %v1727_v16 }
 0x1ad   :  { %v1441_v29 = vpack.c.bf16 %v414_v18, %v413_v24  ;;  %v1445_v30 = vpack.c.bf16 %v416_v19, %v415_v25  ;;  %v1449_v31 = vpack.c.bf16 %v418_v20, %v417_v26  ;;  %v1457_v18 = vpack.c.bf16 %v1712_v63, %v1720_v11  ;;  %v85_v24 = vld [vmem:[#allocation5 + $0xd0] sm:$0xff] }
 0x1ae   :  { %324 = vxpose.xlu0.b32.end [2/2] (short) (narrow) %v246_v27, 32  ;;  %v1453_v32 = vpack.c.bf16 %v420_v21, %v419_v28  ;;  %v1461_v19 = vpack.c.bf16 %v1714_v5, %v1722_v12  ;;  %v1465_v20 = vpack.c.bf16 %v1716_v6, %v1724_v13  ;;  %v1469_v21 = vpack.c.bf16 %v1718_v7, %v1727_v16  ;;  %v86_v12 = vld [vmem:[#allocation5 + $0x100] sm:$0xff]  ;;  %v57_v7 = vld [vmem:[#allocation5 + $0x18] sm:$0xff]  ;;  %v58_v16 = vld [vmem:[#allocation5 + $0x48] sm:$0xff] }
 0x1af   :  { %1442 = vmatprep.subr.bf16.mxu1 %v1441_v29  ;;  %v1473_v26 = vpack.c.bf16 %v58_v16, %v57_v7  ;;  %v59_v27 = vld [vmem:[#allocation5 + $0x78] sm:$0xff]  ;;  %v60_v28 = vld [vmem:[#allocation5 + $0xa8] sm:$0xff]  ;;  %v72_v7 = vld [vmem:[#allocation5 + $0x150] sm:$0xff] }
 0x1b0   :  { %1444 = vmatpush3.bf16.msra.mxu1 %v1441_v29  ;;  %v1477_v29 = vpack.c.bf16 %v60_v28, %v59_v27  ;;  %v74_v27 = vld [vmem:[#allocation5 + $0x1b0] sm:$0xff] }
 0x1b1   :  { %1446 = vmatprep.subr.bf16.mxu1 %v1445_v30 }
 0x1b4   :  { %1448 = vmatpush3.bf16.msra.mxu1 %v1445_v30 }
 0x1b5   :  { %1450 = vmatprep.subr.bf16.mxu1 %v1449_v31 }
 0x1b8   :  { %1452 = vmatpush3.bf16.msra.mxu1 %v1449_v31 }
 0x1b9   :  { %1454 = vmatprep.subr.bf16.mxu1 %v1453_v32 }
 0x1bc   :  { %1456 = vmatpush3.bf16.msra.mxu1 %v1453_v32 }
 0x1bd   :  { %1474 = vmatprep.subr.bf16.mxu1 %v1473_v26 }
 0x22a   :  { %v339_v33 = vpop.trf.xlu0 }
 0x22b   :  { %359 = vrot.lane.b32.xlu1 %v339_v33, %s1630_s17 }
 0x22e   :  { %v340_v34 = vpop.trf.xlu0 }
 0x22f   :  { %371 = vrot.lane.b32.xlu1 %v339_v33, %s1631_s18 }
 0x232   :  { %v341_v35 = vpop.trf.xlu0 }
 0x233   :  { %383 = vrot.lane.b32.xlu1 %v339_v33, %s1628_s9 }
 0x236   :  { %v342_v36 = vpop.trf.xlu0 }
 0x237   :  { %361 = vrot.lane.b32.xlu1 %v340_v34, %s1630_s17  ;;  %377 = vrot.lane.b32.xlu0 %v342_v36, %s1631_s18 }
 0x23b   :  { %373 = vrot.lane.b32.xlu1 %v340_v34, %s1631_s18 }
 0x23f   :  { %385 = vrot.lane.b32.xlu1 %v340_v34, %s1628_s9 }
 0x243   :  { %363 = vrot.lane.b32.xlu1 %v341_v35, %s1630_s17 }
 0x247   :  { %375 = vrot.lane.b32.xlu1 %v341_v35, %s1631_s18 }
 0x24b   :  { %365 = vrot.lane.b32.xlu1 %v342_v36, %s1630_s17 }
 0x24f   :  { %387 = vrot.lane.b32.xlu1 %v341_v35, %s1628_s9 }
 0x253   :  { %389 = vrot.lane.b32.xlu1 %v342_v36, %s1628_s9 }
 0x29d   :  { %v360_v37 = vpop.permute.xlu1 %359 }
 0x29e   :  { %v396_v42 = vsel %vm395_vm1, %v339_v33, %v360_v37 }
 0x2a1   :  { %v372_v38 = vpop.permute.xlu1 %371 }
 0x2a2   :  { %v400_v43 = vsel %vm101_vm0, %v396_v42, %v372_v38  ;;  %v1224_v38 = vld [vmem:[%s1833_s2 + $0x7] ss:$0 sm:$0xff] }
 0x2a5   :  { %v384_v39 = vpop.permute.xlu1 %383 }
 0x2a6   :  { %v405_v45 = vsel %vm404_vm2, %v400_v43, %v384_v39 }
 0x2a7   :  { %v409_v51 = vmul.f32 %v405_v45, %v88_v44 }
 0x2a9   :  { %v362_v40 = vpop.permute.xlu1 %361  ;;  %v378_v59 = vpop.permute.xlu0 %377 }
 0x2aa   :  { %v397_v46 = vsel %vm395_vm1, %v340_v34, %v362_v40 }
 0x2ad   :  { %v374_v41 = vpop.permute.xlu1 %373 }
 0x2ae   :  { %v401_v48 = vsel %vm101_vm0, %v397_v46, %v374_v41 }
 0x2b1   :  { %v386_v49 = vpop.permute.xlu1 %385 }
 0x2b2   :  { %v406_v50 = vsel %vm404_vm2, %v401_v48, %v386_v49  ;;  %v61_v49 = vld [vmem:[#allocation5 + $0x20] sm:$0xff] }
 0x2b3   :  { %v410_v52 = vmul.f32 %v406_v50, %v89_v47  ;;  %v62_v50 = vld [vmem:[#allocation5 + $0x50] sm:$0xff] }
 0x2b5   :  { %v364_v53 = vpop.permute.xlu1 %363  ;;  %v1433_v54 = vpack.c.bf16 %v410_v52, %v409_v51  ;;  %v63_v51 = vld [vmem:[#allocation5 + $0x80] sm:$0xff]  ;;  %v1481_v52 = vpack.c.bf16 %v62_v50, %v61_v49 }
 0x2b6   :  { %v398_v58 = vsel %vm395_vm1, %v341_v35, %v364_v53  ;;  %v64_v53 = vld [vmem:[#allocation5 + $0xb0] sm:$0xff] }
 0x2b7   :  { %1434 = vmatprep.subr.bf16.mxu0 %v1433_v54 }
 0x2b8   :  { %1436 = vmatpush3.bf16.msra.mxu0 %v1433_v54  ;;  %v1485_v54 = vpack.c.bf16 %v64_v53, %v63_v51 }
 0x2b9   :  { %v376_v55 = vpop.permute.xlu1 %375 }
 0x2ba   :  { %v402_v61 = vsel %vm101_vm0, %v398_v58, %v376_v55 }
 0x2bd   :  { %v366_v56 = vpop.permute.xlu1 %365 }
 0x2be   :  { %v399_v60 = vsel %vm395_vm1, %v342_v36, %v366_v56 }
 0x2bf   :  { %v403_v4 = vsel %vm101_vm0, %v399_v60, %v378_v59 }
 0x2c1   :  { %v388_v57 = vpop.permute.xlu1 %387 }
 0x2c2   :  { %v407_v2 = vsel %vm404_vm2, %v402_v61, %v388_v57 }
 0x2c3   :  { %v411_v10 = vmul.f32 %v407_v2, %v90_v62 }
 0x2c5   :  { %v390_v8 = vpop.permute.xlu1 %389 }
 0x2c6   :  { %v408_v9 = vsel %vm404_vm2, %v403_v4, %v390_v8 }
 0x2c7   :  { %v412_v14 = vmul.f32 %v408_v9, %v91_v3 }
 0x2c9   :  { %v1437_v17 = vpack.c.bf16 %v412_v14, %v411_v10 }
 0x2cb   :  { %1438 = vmatprep.subr.bf16.mxu0 %v1437_v17 }
 0x2cc   :  { %1440 = vmatpush3.bf16.msra.mxu0 %v1437_v17 }
 0x2cd   :  { %1458 = vmatprep.subr.bf16.mxu0 %v1457_v18 }
 0x2cf   :  { %1318 = vmatmul.mubr.msk.f32.vlgmr.msra.gmra.mrb[4].mxu0 %vm101_vm0, %v1733_v22 }
 0x2d0   :  { %1460 = vmatpush3.bf16.msra.mxu0 %v1457_v18 }
 0x2d1   :  { %1462 = vmatprep.subr.bf16.mxu0 %v1461_v19 }
 0x2d4   :  { %1464 = vmatpush3.bf16.msra.mxu0 %v1461_v19 }
 0x2d5   :  { %1466 = vmatprep.subr.bf16.mxu0 %v1465_v20 }
 0x2d8   :  { %1468 = vmatpush3.bf16.msra.mxu0 %v1465_v20  ;;  %v1225_v20 = vld [vmem:[%s1833_s2 + $0x2] ss:$0 sm:$0xff] }
 0x2d9   :  { %1470 = vmatprep.subr.bf16.mxu0 %v1469_v21 }
 0x2dc   :  { %1472 = vmatpush3.bf16.msra.mxu0 %v1469_v21 }
 0x2dd   :  { %1482 = vmatprep.subr.bf16.mxu0 %v1481_v52 }
 0x3a2   :  { %v1319_v22 = vpop.f32.mrb[4].mxu0 }
 0x3a3   :  { %v504_v23 = vmul.f32 1.442695, %v1319_v22  ;;  %v493_v63 = vpop.f32.mrb[5].mxu0 }
 0x3a4   :  { %v502_v11 = vmul.f32 1.442695, %v493_v63  ;;  %v1226_v63 = vld [vmem:[%s1833_s2 + $0x3] ss:$0 sm:$0xff] }
 0x3a5   :  { %1531 = vpow2.f32 %v504_v23 }
 0x3a6   :  { %1533 = vpow2.f32 %v502_v11 }
 0x3af   :  { %v1532_v5 = vpop.eup %1531 }
 0x3b0   :  { %v1534_v25 = vpop.eup %1533  ;;  %v507_v13 = vmul.f32 %v1532_v5, %v86_v12  ;;  %v69_v12 = vld [vmem:[#allocation5 + $0xc0] sm:$0xff] }
 0x3b1   :  { %v506_v6 = vmul.f32 %v1534_v25, %v85_v24  ;;  %v70_v25 = vld [vmem:[#allocation5 + $0xf0] sm:$0xff] }
 0x3b3   :  { %1336 = vmatprep.mubr.msk.f32.mxu1 %vm508_vm3, %v506_v6  ;;  %1355 = vmatprep.mubr.msk.f32.mxu0 %vm508_vm3, %v506_v6  ;;  %v1489_v6 = vpack.c.bf16 %v70_v25, %v69_v12 }
 0x3b4   :  { %1337 = vmatmul.mubr.msk.f32.vlgmr.msra.gmra.mrb[2].mxu1 %vm508_vm3, %v507_v13  ;;  %1356 = vmatmul.mubr.msk.f32.vlgmr.msra.gmra.mrb[6].mxu0 %vm508_vm3, %v507_v13  ;;  %v71_v13 = vld [vmem:[#allocation5 + $0x120] sm:$0xff] }
 0x3b5   :  { %1476 = vmatpush3.bf16.msra.mxu1 %v1473_v26  ;;  %1484 = vmatpush3.bf16.msra.mxu0 %v1481_v52  ;;  %v1493_v16 = vpack.c.bf16 %v72_v7, %v71_v13  ;;  %v73_v26 = vld [vmem:[#allocation5 + $0x180] sm:$0xff] }
 0x3b6   :  { %1478 = vmatprep.subr.bf16.mxu1 %v1477_v29  ;;  %1486 = vmatprep.subr.bf16.mxu0 %v1485_v54  ;;  %v1497_v28 = vpack.c.bf16 %v74_v27, %v73_v26 }
 0x3b9   :  { %1480 = vmatpush3.bf16.msra.mxu1 %v1477_v29  ;;  %1488 = vmatpush3.bf16.msra.mxu0 %v1485_v54  ;;  %v75_v29 = vld [vmem:[#allocation5 + $0x1e0] sm:$0xff] }
 0x3ba   :  { %1490 = vmatprep.subr.bf16.mxu1 %v1489_v6 }
 0x487   :  { %v1338_v30 = vpop.f32.mrb[2].mxu1  ;;  %v1357_v31 = vpop.f32.mrb[6].mxu0 }
 0x488   :  { %1535 = vrcp.f32 %v1357_v31  ;;  %v581_v32 = vpop.f32.mrb[3].mxu1  ;;  %v656_v33 = vpop.f32.mrb[7].mxu0 }
 0x489   :  { %1537 = vrcp.f32 %v656_v33 }
 0x492   :  { %v1536_v34 = vpop.eup %1535 }
 0x493   :  { %v1538_v35 = vpop.eup %1537  ;;  %v668_v36 = vmul.f32 %v1536_v34, %v1338_v30  ;;  %v76_v30 = vld [vmem:[#allocation5 + $0x210] sm:$0xff] }
 0x494   :  { %v667_v37 = vmul.f32 %v1538_v35, %v581_v32  ;;  %v1501_v31 = vpack.c.bf16 %v76_v30, %v75_v29  ;;  %v1227_v32 = vld [vmem:[%s1833_s2 + $0x8] ss:$0 sm:$0xff] }
 0x496   :  { %1366 = vmatprep.mubr.msk.f32.mxu1 %vm101_vm0, %v667_v37 }
 0x497   :  { %1367 = vmatmul.mubr.msk.f32.vlgmr.msra.gmra.mrb[4].mxu1 %vm101_vm0, %v668_v36 }
 0x498   :  { %1492 = vmatpush3.bf16.msra.mxu1 %v1489_v6 }
 0x499   :  { %1494 = vmatprep.subr.bf16.mxu1 %v1493_v16 }
 0x49c   :  { %1496 = vmatpush3.bf16.msra.mxu1 %v1493_v16 }
 0x49d   :  { %1498 = vmatprep.subr.bf16.mxu1 %v1497_v28 }
 0x4a0   :  { %1500 = vmatpush3.bf16.msra.mxu1 %v1497_v28 }
 0x4a1   :  { %1502 = vmatprep.subr.bf16.mxu1 %v1501_v31 }
 0x4a4   :  { %1504 = vmatpush3.bf16.msra.mxu1 %v1501_v31  ;;  %v1633_v31 = vmov 0.0|0.0  }
 0x4a5   :  { %1505 = vmatprep.subr.bf16.mxu0 %v1633_v31 }
 0x56a   :  { %v1368_v39 = vpop.f32.mrb[4].mxu1 }
 0x56b   :  { %v751_v40 = vadd.f32 %v1368_v39, %v1681_v0  ;;  %v741_v41 = vpop.f32.mrb[5].mxu1 }
 0x56c   :  { %v750_v42 = vadd.f32 %v741_v41, %v1683_v1 }
 0x56d   :  { %v1776_v43 = vadd.f32 %v1224_v38, %v751_v40 }
 0x56e   :  { %v1778_v44 = vadd.f32 %v1224_v38, %v750_v42 }
 0x56f   :  { %v763_v45 = vsel %vm101_vm0, %v1776_v43, 0.0  ;;  %v769_v46 = vmul.f32 %v1776_v43, %v1776_v43 }
 0x570   :  { %764 = vadd.xlane.f32.xlu1 %v763_v45  ;;  %v760_v0 = vsel %vm101_vm0, %v1778_v44, 0.0  ;;  %v768_v1 = vmul.f32 %v1778_v44, %v1778_v44 }
 0x571   :  { %v773_v47 = vsel %vm101_vm0, %v769_v46, 0.0 }
 0x572   :  { %774 = vadd.xlane.f32.xlu0 %v773_v47  ;;  %v770_v48 = vsel %vm101_vm0, %v768_v1, 0.0 }
 0x574   :  { %761 = vadd.xlane.f32.xlu1 %v760_v0 }
 0x578   :  { %771 = vadd.xlane.f32.xlu1 %v770_v48 }
 0x5fd   :  { %v765_v55 = vpop.xlane.xlu1 %764 }
 0x5fe   :  { %v767_v56 = vmul.f32 0.03125, %v765_v55 }
 0x5ff   :  { %v775_v57 = vpop.xlane.xlu0 %774 }
 0x600   :  { %v779_v58 = vmul.f32 %v767_v56, %v767_v56  ;;  %v777_v59 = vmul.f32 0.03125, %v775_v57  ;;  %v783_v17 = vsub.f32 %v1776_v43, %v767_v56 }
 0x601   :  { %v762_v60 = vpop.xlane.xlu1 %761 }
 0x602   :  { %v781_v61 = vsub.f32 %v777_v59, %v779_v58  ;;  %v766_v62 = vmul.f32 0.03125, %v762_v60 }
 0x604   :  { %v785_v2 = vadd.f32 1e-05, %v781_v61  ;;  %v778_v4 = vmul.f32 %v766_v62, %v766_v62  ;;  %v782_v19 = vsub.f32 %v1778_v44, %v766_v62 }
 0x605   :  { %v772_v3 = vpop.xlane.xlu1 %771 }
 0x606   :  { %v776_v8 = vmul.f32 0.03125, %v772_v3  ;;  %1539 = vrsqrt.f32 %v785_v2 }
 0x608   :  { %v780_v9 = vsub.f32 %v776_v8, %v778_v4 }
 0x60a   :  { %v784_v10 = vadd.f32 1e-05, %v780_v9 }
 0x60c   :  { %1541 = vrsqrt.f32 %v784_v10 }
 0x610   :  { %v1540_v14 = vpop.eup %1539 }
 0x611   :  { %v789_v18 = vmul.f32 %v1540_v14, %v783_v17 }
 0x613   :  { %v797_v23 = vmul.f32 %v1225_v20, %v789_v18 }
 0x615   :  { %v805_v5 = vadd.f32 %v1226_v63, %v797_v23 }
 0x616   :  { %v1542_v21 = vpop.eup %1541 }
 0x617   :  { %v788_v22 = vmul.f32 %v1542_v21, %v782_v19 }
 0x619   :  { %v796_v11 = vmul.f32 %v1225_v20, %v788_v22 }
 0x61b   :  { %v804_v24 = vadd.f32 %v1226_v63, %v796_v11 }
 0x61d   :  { %1377 = vmatprep.mubr.msk.f32.mxu0 %vm101_vm0, %v804_v24 }
 0x61e   :  { %1378 = vmatmul.mubr.msk.f32.vlgmr.msra.gmra.mrb[8].mxu0 %vm101_vm0, %v805_v5  ;;  %v1632_v5 = vmov -1.0  }
 0x61f   :  { %1403 = vmatprep.mubr.msk.f32.mxu0 %vm1634_vm6, %v1629_v15 }
 0x6f1   :  { %v1379_v33 = vpop.f32.mrb[8].mxu0 }
 0x6f2   :  { %v890_v34 = vadd.f32 %v1379_v33, %v1227_v32  ;;  %v884_v35 = vpop.f32.mrb[9].mxu0 }
 0x6f3   :  { %v885_v36 = vadd.f32 %v1227_v32, %v884_v35  ;;  %v1232_v32 = vld [vmem:[%s1833_s2 + $0x9] ss:$0 sm:$0xff] }
 0x6f4   :  { %v896_v37 = vmul.f32 0.70710677, %v890_v34  ;;  %v894_v28 = vmul.f32 0.5, %v890_v34 }
 0x6f5   :  { %v895_v38 = vmul.f32 0.70710677, %v885_v36  ;;  %v893_v26 = vmul.f32 0.5, %v885_v36 }
 0x6f6   :  { %v902_v39 = vand.u32 2147483647, %v896_v37  ;;  %vm898_vm4 = vcmp.ge.f32.partialorder %v896_v37, 0.0 }
 0x6f7   :  { %v901_v40 = vand.u32 2147483647, %v895_v38  ;;  %vm897_vm5 = vcmp.ge.f32.partialorder %v895_v38, 0.0  ;;  %v900_v12 = vsel %vm898_vm4, 1.0, %v1632_v5 }
 0x6f8   :  { %v904_v41 = vmul.f32 0.3275911, %v902_v39  ;;  %v932_v46 = vsub.f32 0.0, %v902_v39  ;;  %v899_v13 = vsel %vm897_vm5, 1.0, %v1632_v5 }
 0x6f9   :  { %v903_v42 = vmul.f32 0.3275911, %v901_v40  ;;  %v931_v0 = vsub.f32 0.0, %v901_v40 }
 0x6fa   :  { %v906_v45 = vadd.f32 1.0, %v904_v41  ;;  %v934_v1 = vmul.f32 %v932_v46, %v902_v39  ;;  %v65_v39 = vld [vmem:[#allocation5 + $0x28] sm:$0xff] }
 0x6fb   :  { %v905_v47 = vadd.f32 1.0, %v903_v42  ;;  %v933_v48 = vmul.f32 %v931_v0, %v901_v40  ;;  %v66_v40 = vld [vmem:[#allocation5 + $0x58] sm:$0xff]  ;;  %v87_v42 = vld [vmem:[#allocation5 + $0x130] sm:$0x3]  ;;  %v67_v46 = vld [vmem:[#allocation5 + $0x88] sm:$0xff] }
 0x6fc   :  { %1543 = vrcp.f32 %v906_v45  ;;  %v937_v49 = vmul.f32 1.442695, %v934_v1  ;;  %v1509_v45 = vpack.c.bf16 %v66_v40, %v65_v39  ;;  %v1234_v1 = vld [vmem:[%s1833_s2 + $0xa] ss:$0 sm:$0xff] }
 0x6fd   :  { %1545 = vrcp.f32 %v905_v47  ;;  %v935_v50 = vmul.f32 1.442695, %v933_v48  ;;  %v68_v47 = vld [vmem:[#allocation5 + $0xb8] sm:$0xff] }
 0x6fe   :  { %1547 = vpow2.f32 %v937_v49  ;;  %v1512_v0 = vpack.c.bf16 %v68_v47, %v67_v46 }
 0x6ff   :  { %1549 = vpow2.f32 %v935_v50 }
 0x706   :  { %v1544_v51 = vpop.eup %1543 }
 0x707   :  { %v1546_v52 = vpop.eup %1545  ;;  %v910_v53 = vmul.f32 %v1544_v51, %v1544_v51  ;;  %v914_v54 = vmul.f32 -0.28449672, %v1544_v51  ;;  %v918_v55 = vmul.f32 -1.4531521, %v1544_v51 }
 0x708   :  { %v909_v56 = vmul.f32 %v1546_v52, %v1546_v52  ;;  %v913_v57 = vmul.f32 -0.28449672, %v1546_v52  ;;  %v917_v58 = vmul.f32 -1.4531521, %v1546_v52  ;;  %v1548_v21 = vpop.eup %1547 }
 0x709   :  { %v916_v59 = vadd.f32 0.2548296, %v914_v54  ;;  %v920_v60 = vadd.f32 1.4214138, %v918_v55  ;;  %v922_v61 = vmul.f32 1.0614054, %v910_v53  ;;  %v912_v4 = vmul.f32 %v1544_v51, %v910_v53  ;;  %v1550_v23 = vpop.eup %1549 }
 0x70a   :  { %v915_v62 = vadd.f32 0.2548296, %v913_v57  ;;  %v919_v2 = vadd.f32 1.4214138, %v917_v58  ;;  %v921_v3 = vmul.f32 1.0614054, %v909_v56  ;;  %v911_v9 = vmul.f32 %v1546_v52, %v909_v56 }
 0x70b   :  { %v924_v8 = vadd.f32 %v922_v61, %v920_v60  ;;  %v926_v14 = vmul.f32 %v1544_v51, %v916_v59 }
 0x70c   :  { %v923_v10 = vadd.f32 %v921_v3, %v919_v2  ;;  %v925_v18 = vmul.f32 %v1546_v52, %v915_v62 }
 0x70d   :  { %v928_v17 = vmul.f32 %v924_v8, %v912_v4 }
 0x70e   :  { %v927_v19 = vmul.f32 %v923_v10, %v911_v9 }
 0x70f   :  { %v930_v20 = vadd.f32 %v928_v17, %v926_v14 }
 0x710   :  { %v929_v22 = vadd.f32 %v927_v19, %v925_v18 }
 0x711   :  { %v940_v63 = vmul.f32 %v1548_v21, %v930_v20 }
 0x712   :  { %v939_v11 = vmul.f32 %v1550_v23, %v929_v22 }
 0x713   :  { %v942_v24 = vsub.f32 1.0, %v940_v63 }
 0x714   :  { %v941_v25 = vsub.f32 1.0, %v939_v11 }
 0x715   :  { %v944_v6 = vmul.f32 %v942_v24, %v900_v12 }
 0x716   :  { %v943_v7 = vmul.f32 %v941_v25, %v899_v13 }
 0x717   :  { %v946_v16 = vadd.f32 1.0, %v944_v6 }
 0x718   :  { %v945_v27 = vadd.f32 1.0, %v943_v7 }
 0x719   :  { %v948_v30 = vmul.f32 %v946_v16, %v894_v28 }
 0x71a   :  { %v947_v29 = vmul.f32 %v945_v27, %v893_v26 }
 0x71c   :  { %1396 = vmatprep.mubr.msk.f32.mxu1 %vm508_vm3, %v947_v29 }
 0x71d   :  { %1397 = vmatmul.mubr.msk.f32.vlgmr.msra.gmra.mrb[6].mxu1 %vm508_vm3, %v948_v30 }
 0x7f0   :  { %v1398_v33 = vpop.f32.mrb[6].mxu1 }
 0x7f1   :  { %v1031_v35 = vadd.f32 %v1398_v33, %v1776_v43  ;;  %v1021_v34 = vpop.f32.mrb[7].mxu1 }
 0x7f2   :  { %v1030_v36 = vadd.f32 %v1021_v34, %v1778_v44 }
 0x7f3   :  { %v1039_v37 = vadd.f32 %v1232_v32, %v1031_v35 }
 0x7f4   :  { %v1038_v38 = vadd.f32 %v1232_v32, %v1030_v36 }
 0x7f6   :  { %v1506_v41 = vpack.c.bf16 %v1039_v37, %v1038_v38 }
 0x7f8   :  { %1507 = vmatpush3.bf16.msra.mxu0 %v1506_v41 }
 0x7f9   :  { %1508 = vmatprep.subr.bf16.mxu0 %v1633_v31 }
 0x7fb   :  { %1404 = vmatmul.mubr.msk.f32.vlgmr.msra.gmra.mrb[10].mxu0 %vm395_vm1, %v87_v42 }
 0x7fc   :  { %1510 = vmatpush3.bf16.msra.mxu0 %v1509_v45  ;;  %1414 = vmatprep.mubr.msk.f32.mxu0 %vm1634_vm6, %v1629_v15 }
 0x7fd   :  { %1511 = vmatprep.subr.bf16.mxu0 %v1633_v31 }
 0x800   :  { %1513 = vmatpush3.bf16.msra.mxu0 %v1512_v0 }
 0x8ce   :  { %v1109_v43 = vpop.f32.mrb[10].mxu0 }
 0x8cf   :  { %v1405_v44 = vpop.f32.mrb[11].mxu0  ;;  %1415 = vmatmul.mubr.msk.f32.vlgmr.msra.gmra.mrb[12].mxu0 %vm101_vm0, %v1109_v43 }
 0x9a2   :  { %v1188_v48 = vpop.f32.mrb[12].mxu0 }
 0x9a3   :  { %v1189_v49 = vadd.f32 %v1234_v1, %v1188_v48  ;;  %v1416_v50 = vpop.f32.mrb[13].mxu0 }
 0x9a5   :  { %1193 = vst.msk [vmem:[#allocation7] sm:$0x3] %vm1192_vm7, %v1189_v49 }
 0x9a6   :  { %1606 = shalt.err (!%p1603_p6)
}
 0x9a7   :  { %s1607_s0 = scalar_lea.hbm %s1834_s3, 32 }
 0x9a8   :  { %p1608_p7 = scmp.ne.s32.totalorder %s1834_s3, %s1607_s0  ;;  %p1611_p8 = scmp.lt.u32.totalorder %s1607_s0, %s1834_s3 }
 0x9aa   :  { %p1613_p9 = pnand %p1611_p8, %p1608_p7 }
 0x9ac   :  { %1616 = shalt.err (!%p1613_p9)
}
 0x9ad   :  { %1203 = dma.vmem_to_hbm [thread:$0]  %s1201_s5, 32, %s1834_s3, [#allocation4]  }
 0x9ae   :  { %1621 = dma.done.wait [#allocation4], 32  }
 0x9af   :  { %1622 = vsyncadd [#allocation4], 4294967264 }
 0x9b0   :  { %1207 = vsyncpa [#allocation3], 1 }
 0x9b1   :  { %1208 = vsyncpa [#allocation6], 1 }
 0x9b2   :  { %1209 = vsyncpa [#allocation4], 1 }

</bundles_post_ra>
